<compile_context>
chip_gen: v6e
topology: v6e:2x2x1
jax: 0.10.0
libtpu: 0.0.40
codegen_flags: <defaults>
</compile_context>

<pallas_src>
import jax
import jax.numpy as jnp
from jax.experimental import pallas as pl
from jax.experimental.pallas import tpu as pltpu

LANES = 128
SUBLANES = 8
BLOCK_BYTES = 4 * 1024 * 1024        # per-input, per-grid-step DMA block budget (~4 MiB)
VMEM_LIMIT_BYTES = 32 * 1024 * 1024  # 2 inputs x 2 buffers x 4 MiB = 16 MiB live + slack


def _cdiv(a, b):
    return (a + b - 1) // b


def _num_tensorcores():
    """Best-effort TensorCores-per-chip (1 on v5e/v6e, 2 on v7x); safe fallback = 1."""
    try:
        info = pltpu.get_tpu_info()
    except Exception:
        return 1
    for name in ("num_cores", "core_count", "num_tensorcores",
                 "cores_per_chip", "num_cores_per_chip", "tensorcores_per_chip"):
        v = getattr(info, name, None)
        if isinstance(v, int) and 1 <= v <= 8:
            return v
    return 1


def _make_ssd_kernel(tile_rows, inner, rows_valid, need_mask):
    """Accumulate per-lane partial sums of (x0 - x1)^2 into an (8, 128) f32 slab."""

    def kernel(x0_ref, x1_ref, acc_ref):
        i = pl.program_id(0)   # slice (TensorCore) axis
        j = pl.program_id(1)   # streaming axis

        @pl.when(j == 0)
        def _():
            acc_ref[...] = jnp.zeros_like(acc_ref)

        d = x0_ref[...].astype(jnp.float32) - x1_ref[...].astype(jnp.float32)
        dd = d * d

        if need_mask:
            # Zero rows past the true end of the data (ragged last block, and any
            # phantom trailing blocks created by the per-core split).  Pure VPU work,
            # only emitted when coverage != true rows (aligned inputs pay nothing).
            base = (i * inner + j) * tile_rows
            ridx = base + jax.lax.broadcasted_iota(jnp.int32, (tile_rows, LANES), 0)
            dd = jnp.where(ridx < rows_valid, dd, 0.0)

        if tile_rows % SUBLANES == 0:
            # Fold the (tile_rows, 128) block onto one vreg-shaped accumulator
            # (plain VPU adds, no XLU on the hot path).
            acc_ref[...] += dd.reshape(-1, SUBLANES, LANES).sum(axis=0)
        else:
            # Tiny single-block case (whole array is smaller than one sublane group).
            acc_ref[0:1, :] += jnp.sum(dd, axis=0, keepdims=True)

    return kernel


def _sum_sq_diff(x0, x1, block_bytes=BLOCK_BYTES):
    """Global sum((x0 - x1)^2), streamed through a Pallas kernel.  Returns (ssd, n)."""
    assert x0.shape == x1.shape and x0.dtype == x1.dtype
    total = x0.size
    itemsize = jnp.dtype(x0.dtype).itemsize

    x0 = x0.reshape(-1)
    x1 = x1.reshape(-1)

    # Lane alignment: totals that are multiples of 128 reshape for free (no HBM copy).
    # Only non-128-aligned totals pay a tiny (<=127 zero elements) pad copy.
    lane_pad = (-total) % LANES
    if lane_pad:
        x0 = jnp.pad(x0, (0, lane_pad))
        x1 = jnp.pad(x1, (0, lane_pad))
    rows = (total + lane_pad) // LANES
    x0 = x0.reshape(rows, LANES)
    x1 = x1.reshape(rows, LANES)

    # Dtype-aware block size: ~block_bytes per input per grid step
    # (f32 -> 8192 rows, bf16 -> 16384 rows at the 4 MiB default).
    sub = 16 if itemsize < 4 else SUBLANES            # keep bf16 sublane packing happy
    budget_rows = max(sub, (block_bytes // (LANES * itemsize)) // sub * sub)

    n_slices = _num_tensorcores()
    if n_slices == 1 and rows <= budget_rows:
        tile_rows = rows                              # single full-array block
    else:
        tile_rows = min(budget_rows, _cdiv(rows, sub) * sub)
    num_tiles = _cdiv(rows, tile_rows)
    n_slices = min(n_slices, num_tiles)
    inner = _cdiv(num_tiles, n_slices)
    need_mask = (n_slices * inner * tile_rows) != rows

    def in_map(i, j):
        # Clamp so phantom trailing blocks never index past the last real block;
        # their contribution is masked to zero inside the kernel.
        return (jnp.minimum(i * inner + j, num_tiles - 1), 0)

    kernel = _make_ssd_kernel(tile_rows, inner, rows, need_mask)

    if n_slices > 1:
        # Actually shard the slice axis across TensorCores (v7x); plain "parallel"
        # has been measured not to change codegen for this.
        dims = (pltpu.CORE_PARALLEL, pltpu.ARBITRARY)
    else:
        dims = (pltpu.ARBITRARY, pltpu.ARBITRARY)

    cost = pl.CostEstimate(
        flops=3 * total,                 # sub + mul + accumulate per element
        transcendentals=0,
        bytes_accessed=2 * total * itemsize + n_slices * SUBLANES * LANES * 4,
    )

    partials = pl.pallas_call(
        kernel,
        out_shape=jax.ShapeDtypeStruct((n_slices, SUBLANES, LANES), jnp.float32),
        grid_spec=pltpu.PrefetchScalarGridSpec(
            num_scalar_prefetch=0,
            grid=(n_slices, inner),
            in_specs=[
                pl.BlockSpec((tile_rows, LANES), in_map),
                pl.BlockSpec((tile_rows, LANES), in_map),
            ],
            out_specs=pl.BlockSpec((None, SUBLANES, LANES), lambda i, j: (i, 0, 0)),
        ),
        compiler_params=pltpu.CompilerParams(
            dimension_semantics=dims,
            vmem_limit_bytes=VMEM_LIMIT_BYTES,
        ),
        cost_estimate=cost,
    )(x0, x1)

    return jnp.sum(partials), total


def cffn_energy_loss(img0, img1, pairs_indicator, m_th=0.5, *, block_bytes=BLOCK_BYTES):
    """img0/img1: matching shape (e.g. NCHW), any float dtype.  pairs_indicator: (B,)."""
    ssd, total = _sum_sq_diff(img0, img1, block_bytes)
    e_w = ssd * jnp.float32(1.0 / total)              # MSE, mean over true element count
    pairs = pairs_indicator.astype(jnp.float32)
    hinge = jnp.maximum(jnp.float32(0.0), (jnp.float32(m_th) - e_w) ** 2)
    return 0.5 * (pairs * e_w * e_w) + (1.0 - pairs) * hinge


def _reference(img0, img1, pairs, m_th=0.5):
    d = img0.astype(jnp.float32) - img1.astype(jnp.float32)
    e_w = jnp.mean(d * d)
    hinge = jnp.maximum(0.0, (m_th - e_w) ** 2)
    return 0.5 * (pairs * e_w ** 2) + (1.0 - pairs) * hinge


if __name__ == "__main__":
    key = jax.random.PRNGKey(0)
    k0, k1, k2 = jax.random.split(key, 3)

    # f32 NCHW demo (B, C, H, W) = (2, 4, 16, 16)
    B, C, H, W = 2, 4, 16, 16
    img0 = jax.random.normal(k0, (B, C, H, W), dtype=jnp.float32)
    img1 = jax.random.normal(k1, (B, C, H, W), dtype=jnp.float32)
    pairs = (jax.random.uniform(k2, (B,)) > 0.5).astype(jnp.float32)

    out = jax.block_until_ready(cffn_energy_loss(img0, img1, pairs, m_th=0.5))
    ref = _reference(img0, img1, pairs, m_th=0.5)
    assert out.shape == pairs.shape
    assert jnp.allclose(out, ref, atol=1e-5, rtol=1e-5), (out, ref)

    # bf16 inputs streamed at native width (no f32 upcast in HBM)
    out_bf = jax.block_until_ready(
        cffn_energy_loss(img0.astype(jnp.bfloat16), img1.astype(jnp.bfloat16), pairs))
    ref_bf = _reference(img0.astype(jnp.bfloat16), img1.astype(jnp.bfloat16), pairs)
    assert jnp.allclose(out_bf, ref_bf, atol=1e-4, rtol=1e-3), (out_bf, ref_bf)

    # Odd element count (exercises the tiny lane-pad path; mean uses the true count)
    i0 = jax.random.normal(k0, (2, 3, 7, 5), dtype=jnp.float32)
    i1 = jax.random.normal(k1, (2, 3, 7, 5), dtype=jnp.float32)
    out_odd = jax.block_until_ready(cffn_energy_loss(i0, i1, pairs))
    ref_odd = _reference(i0, i1, pairs)
    assert jnp.allclose(out_odd, ref_odd, atol=1e-5, rtol=1e-5), (out_odd, ref_odd)

    # Multi-tile + ragged-last-block path (in-kernel iota mask), using a reduced block
    # budget so the test shapes stay small.  520 rows with 128-row tiles -> 5 tiles,
    # last tile is ragged and masked.
    j0 = jax.random.normal(k0, (2, 4, 64, 130), dtype=jnp.float32)
    j1 = jax.random.normal(k1, (2, 4, 64, 130), dtype=jnp.float32)
    out_mt = jax.block_until_ready(
        cffn_energy_loss(j0, j1, pairs, block_bytes=64 * 1024))
    ref_mt = _reference(j0, j1, pairs)
    assert jnp.allclose(out_mt, ref_mt, atol=1e-5, rtol=1e-4), (out_mt, ref_mt)

    print("KERNEL_OK")
</pallas_src>

<mosaic_0001>
module attributes {stable_mosaic.version = 11 : i64} {
  func.func @kernel(%arg0: i32, %arg1: i32, %arg2: memref<16x128xf32, #tpu.memory_space<vmem>>, %arg3: memref<16x128xf32, #tpu.memory_space<vmem>>, %arg4: memref<1x8x128xf32, #tpu.memory_space<vmem>>) attributes {dimension_semantics = [#tpu.dimension_semantics<arbitrary>, #tpu.dimension_semantics<arbitrary>], iteration_bounds = array<i64: 1, 1>, scalar_prefetch = 0 : i64, scratch_operands = 0 : i64, tpu.core_type = #tpu.core_type<tc>, window_params = [{transform_indices = @transform_0, window_bounds = array<i64: 16, 128>}, {transform_indices = @transform_1, window_bounds = array<i64: 16, 128>}, {transform_indices = @transform_2, window_bounds = array<i64: 1, 8, 128>}]} {
    %c0_i32 = arith.constant 0 : i32
    %0 = arith.cmpi eq, %arg1, %c0_i32 : i32
    %1 = arith.extui %0 : i1 to i32
    %c0_i32_0 = arith.constant 0 : i32
    %2 = arith.cmpi ne, %1, %c0_i32_0 : i32
    scf.if %2 {
      %cst_10 = arith.constant 0.000000e+00 : f32
      %15 = vector.broadcast %cst_10 : f32 to vector<8x128xf32>
      %c0_11 = arith.constant 0 : index
      %c0_12 = arith.constant 0 : index
      %c0_13 = arith.constant 0 : index
      %16 = vector.load %arg4[%c0_11, %c0_12, %c0_13] : memref<1x8x128xf32, #tpu.memory_space<vmem>>, vector<1x8x128xf32>
      %17 = vector.shape_cast %16 : vector<1x8x128xf32> to vector<8x128xf32>
      %18 = vector.shape_cast %15 : vector<8x128xf32> to vector<1x8x128xf32>
      tpu.vector_store %arg4[%c0_11, %c0_12, %c0_13], %18 {strides = array<i32>} : memref<1x8x128xf32, #tpu.memory_space<vmem>>, vector<1x8x128xf32>,
    } else {
    }
    %c0 = arith.constant 0 : index
    %c0_1 = arith.constant 0 : index
    %3 = vector.load %arg2[%c0, %c0_1] : memref<16x128xf32, #tpu.memory_space<vmem>>, vector<16x128xf32>
    %c0_2 = arith.constant 0 : index
    %c0_3 = arith.constant 0 : index
    %4 = vector.load %arg3[%c0_2, %c0_3] : memref<16x128xf32, #tpu.memory_space<vmem>>, vector<16x128xf32>
    %5 = arith.subf %3, %4 : vector<16x128xf32>
    %6 = arith.mulf %5, %5 : vector<16x128xf32>
    %c0_4 = arith.constant 0 : index
    %c0_5 = arith.constant 0 : index
    %c0_6 = arith.constant 0 : index
    %7 = vector.load %arg4[%c0_4, %c0_5, %c0_6] : memref<1x8x128xf32, #tpu.memory_space<vmem>>, vector<1x8x128xf32>
    %8 = vector.shape_cast %7 : vector<1x8x128xf32> to vector<8x128xf32>
    %9 = vector.shape_cast %6 : vector<16x128xf32> to vector<2x8x128xf32>
    %cst = arith.constant dense<0.000000e+00> : vector<8x128xf32>
    %10 = vector.multi_reduction <add>, %9, %cst [0] : vector<2x8x128xf32> to vector<8x128xf32>
    %11 = arith.addf %8, %10 : vector<8x128xf32>
    %c0_7 = arith.constant 0 : index
    %c0_8 = arith.constant 0 : index
    %c0_9 = arith.constant 0 : index
    %12 = vector.load %arg4[%c0_7, %c0_8, %c0_9] : memref<1x8x128xf32, #tpu.memory_space<vmem>>, vector<1x8x128xf32>
    %13 = vector.shape_cast %12 : vector<1x8x128xf32> to vector<8x128xf32>
    %14 = vector.shape_cast %11 : vector<8x128xf32> to vector<1x8x128xf32>
    tpu.vector_store %arg4[%c0_7, %c0_8, %c0_9], %14 {strides = array<i32>} : memref<1x8x128xf32, #tpu.memory_space<vmem>>, vector<1x8x128xf32>,
    return
  }
  func.func @transform_0(%arg0: i32, %arg1: i32) -> (i32, i32) {
    %c1_i32 = arith.constant 1 : i32
    %0 = arith.muli %arg0, %c1_i32 : i32
    %1 = arith.addi %0, %arg1 : i32
    %c0_i32 = arith.constant 0 : i32
    %2 = arith.minsi %1, %c0_i32 : i32
    %c0_i32_0 = arith.constant 0 : i32
    %c0_i32_1 = arith.constant 0 : i32
    return %2, %c0_i32_0 : i32, i32
  }
  func.func @transform_1(%arg0: i32, %arg1: i32) -> (i32, i32) {
    %c1_i32 = arith.constant 1 : i32
    %0 = arith.muli %arg0, %c1_i32 : i32
    %1 = arith.addi %0, %arg1 : i32
    %c0_i32 = arith.constant 0 : i32
    %2 = arith.minsi %1, %c0_i32 : i32
    %c0_i32_0 = arith.constant 0 : i32
    %c0_i32_1 = arith.constant 0 : i32
    return %2, %c0_i32_0 : i32, i32
  }
  func.func @transform_2(%arg0: i32, %arg1: i32) -> (i32, i32, i32) {
    %c0_i32 = arith.constant 0 : i32
    %c0_i32_0 = arith.constant 0 : i32
    %c0_i32_1 = arith.constant 0 : i32
    return %arg0, %c0_i32, %c0_i32_0 : i32, i32, i32
  }
}

</mosaic_0001>

<bundles_post_ra>
// kernel: tpu_custom_call.1
= control target key start
LH: loop header
LB: loop body
LE: loop exit
PB: predicated region body
PF: predicated region fallthrough
CT: control target
= control target key end

     0   :  { %7 = vsyncpa [#allocation3], 0  ;;  %s198_s0 = inlined_call_operand.hbm [shape: f32[16,128], index: 0, kind: input, shape index: {}]   ;;  %s199_s1 = inlined_call_operand.hbm [shape: f32[16,128], index: 1, kind: input, shape index: {}]   ;;  %s200_s2 = inlined_call_operand.hbm [shape: f32[1,8,128], index: 2, kind: output, shape index: {}]  }
   0x1   :  { %8 = vsyncpa [#allocation6], 0 }
   0x2   :  { %9 = vsyncpa [#allocation4], 0  ;;  %s169_s9 = smov [#allocation2]  }
   0x3   :  { %s21_s10 = sshll.u32 %s169_s9, 4  ;;  %s22_s10 = int_to_ptr.vmem [resolvable:$true] %s21_s10 }
   0x4   :  { %s111_s11 = scalar_lea.vmem %s22_s10, 256  ;;  %p116_p1 = scmp.lt.s32.totalorder %s22_s10, %s22_s10 }
   0x5   :  { %p112_p0 = scmp.ne.s32.totalorder %s22_s10, %s111_s11  ;;  %p117_p2 = scmp.lt.s32.totalorder %s111_s11, %s111_s11 }
   0x7   :  { %p118_p3 = por %p117_p2, %p116_p1 }
   0x9   :  { %p119_p4 = pnand %p118_p3, %p112_p0 }
   0xb   :  { %122 = shalt.err (!%p119_p4)
}
   0xc   :  { %s170_s12 = smov 128   ;;  %s171_s13 = smov 8  }
   0xd   :  { %27 = dma.hbm_to_vmem [thread:$0]  %s198_s0, 256, %s22_s10, [#allocation3], %s170_s12, %s170_s12, %s171_s13  }
   0xe   :  { %s172_s16 = smov [#allocation5]  }
   0xf   :  { %s39_s17 = sshll.u32 %s172_s16, 4  ;;  %s40_s17 = int_to_ptr.vmem [resolvable:$true] %s39_s17 }
  0x10   :  { %s131_s18 = scalar_lea.vmem %s40_s17, 256  ;;  %p136_p6 = scmp.lt.s32.totalorder %s40_s17, %s40_s17 }
  0x11   :  { %p132_p5 = scmp.ne.s32.totalorder %s40_s17, %s131_s18  ;;  %p137_p7 = scmp.lt.s32.totalorder %s131_s18, %s131_s18 }
  0x13   :  { %p138_p8 = por %p137_p7, %p136_p6 }
  0x15   :  { %p139_p9 = pnand %p138_p8, %p132_p5 }
  0x17   :  { %142 = shalt.err (!%p139_p9)
}
  0x18   :  { %45 = dma.hbm_to_vmem [thread:$0]  %s199_s1, 256, %s40_s17, [#allocation6], %s170_s12, %s170_s12, %s171_s13  }
  0x19   :  { %163 = dma.done.wait [#allocation3], 256  }
  0x1a   :  { %164 = vsyncadd [#allocation3], 4294967040 }
  0x1b   :  { %165 = dma.done.wait [#allocation6], 256  }
  0x1c   :  { %166 = vsyncadd [#allocation6], 4294967040  ;;  %v65_v0 = vld [vmem:[#allocation2] sm:$0xff]  ;;  %v66_v1 = vld [vmem:[#allocation2 + $0x8] sm:$0xff]  ;;  %s173_s0 = smov [#allocation7]  }
  0x1d   :  { %v67_v2 = vld [vmem:[#allocation5] sm:$0xff]  ;;  %v68_v3 = vld [vmem:[#allocation5 + $0x8] sm:$0xff]  ;;  %s83_s21 = sshll.u32 %s173_s0, 4  ;;  %s84_s21 = int_to_ptr.vmem [resolvable:$true] %s83_s21 }
  0x1e   :  { %v69_v4 = vsub.f32 %v65_v0, %v67_v2  ;;  %v70_v5 = vsub.f32 %v66_v1, %v68_v3  ;;  %s143_s22 = scalar_lea.vmem %s84_s21, 128  ;;  %p148_p11 = scmp.lt.s32.totalorder %s84_s21, %s84_s21 }
  0x1f   :  { %p144_p10 = scmp.ne.s32.totalorder %s84_s21, %s143_s22  ;;  %p149_p12 = scmp.lt.s32.totalorder %s143_s22, %s143_s22 }
  0x20   :  { %v71_v6 = vmul.f32 %v69_v4, %v69_v4  ;;  %v72_v7 = vmul.f32 %v70_v5, %v70_v5 }
  0x21   :  { %p150_p13 = por %p149_p12, %p148_p11 }
  0x22   :  { %v74_v8 = vadd.f32 %v72_v7, %v71_v6 }
  0x23   :  { %p151_p0 = pnand %p150_p13, %p144_p10 }
  0x24   :  { %76 = vst [vmem:[#allocation7] sm:$0xff] %v74_v8 }
  0x25   :  { %154 = shalt.err (!%p151_p0)
}
  0x26   :  { %86 = dma.vmem_to_hbm [thread:$0]  %s84_s21, 128, %s200_s2, [#allocation4]  }
  0x27   :  { %167 = dma.done.wait [#allocation4], 128  }
  0x28   :  { %168 = vsyncadd [#allocation4], 4294967168 }
  0x29   :  { %90 = vsyncpa [#allocation3], 1 }
  0x2a   :  { %91 = vsyncpa [#allocation6], 1 }
  0x2b   :  { %92 = vsyncpa [#allocation4], 1 }

</bundles_post_ra>
